<compile_context>
chip_gen: v5e
topology: v5e:2x2
jax: 0.10.0
libtpu: 0.0.40
codegen_flags: <defaults>
</compile_context>

<pallas_src>
import functools

import numpy as np
import jax
import jax.numpy as jnp
from jax.experimental import pallas as pl
from jax.experimental.pallas import tpu as pltpu


def _round_up(x, m):
    return ((x + m - 1) // m) * m


# ----------------------------------------------------------------------------
# Mel filterbank (torchaudio melscale_fbanks, HTK scale, norm=None) -- host glue
# ----------------------------------------------------------------------------
def mel_filterbank(n_stft, n_mels, sample_rate, f_min, f_max):
    all_freqs = np.linspace(0.0, sample_rate / 2.0, n_stft)

    def hz_to_mel(f):
        return 2595.0 * np.log10(1.0 + f / 700.0)

    def mel_to_hz(m):
        return 700.0 * (10.0 ** (m / 2595.0) - 1.0)

    m_pts = np.linspace(hz_to_mel(f_min), hz_to_mel(f_max), n_mels + 2)
    f_pts = mel_to_hz(m_pts)                                  # (n_mels+2,)
    f_diff = f_pts[1:] - f_pts[:-1]                           # (n_mels+1,)
    slopes = f_pts[None, :] - all_freqs[:, None]              # (n_stft, n_mels+2)
    down = (-1.0 * slopes[:, :-2]) / f_diff[:-1]
    up = slopes[:, 2:] / f_diff[1:]
    fb = np.maximum(0.0, np.minimum(down, up))                # (n_stft, n_mels)
    return fb.astype(np.float32)


# ----------------------------------------------------------------------------
# Fused Pallas kernel: all hot-path compute lives here.
# Shapes inside the kernel (all lane-dense, last dim multiple of 128):
#   xri:  (2, B*T, Fp)   real/imag stacked, freq padded
#   fb:   (Fp, Mp)       ifb: (Mp, Fp)
#   wih1: (Mp, Hp)  whh1/wih2/whh2: (Hp, Hp)
#   w1:   (Hp, Mp)  w2: (Mp, Mp)    biases/gamma/beta: (1, Mp|Hp)
# ----------------------------------------------------------------------------
def melrnn_kernel(xri_ref, fb_ref, ifb_ref,
                  wih1_ref, whh1_ref, wih2_ref, whh2_ref,
                  gamma_ref, beta_ref, w1_ref, b1_ref, w2_ref, b2_ref,
                  out_ref, h2all_ref, *, B, T):
    f32 = jnp.float32
    xr = xri_ref[0, :, :]                 # (B*T, Fp)
    xi = xri_ref[1, :, :]

    # Amplitude: |re^2 - im^2|, then pow(0.3)  (kept in f32 -- v5e EUP has no bf16)
    amp = jnp.abs(xr * xr - xi * xi)
    spec = jnp.where(amp > 0.0,
                     jnp.exp(0.3 * jnp.log(jnp.maximum(amp, 1e-30))),
                     0.0)                 # (B*T, Fp)

    # MelScale + hoisted layer-1 input projection: sequence-independent, so do them
    # as two big lane-dense matmuls instead of 2*B tiny ones inside the recurrence.
    xmel = jnp.dot(spec, fb_ref[...], preferred_element_type=f32)      # (B*T, Mp)
    u1 = jnp.dot(xmel, wih1_ref[...], preferred_element_type=f32)      # (B*T, Hp)

    whh1 = whh1_ref[...]
    wih2 = wih2_ref[...]
    whh2 = whh2_ref[...]
    Hp = whh1.shape[0]

    # nn.RNN(batch_first=False) on a (B, T, n_mels) tensor: seq_len = B, batch = T.
    # Two tanh layers, no bias, h0 = 0.  B is tiny -> static unroll; h2 tiles are
    # written straight into VMEM scratch (no concatenate / relayout).
    h1 = jnp.zeros((T, Hp), f32)
    h2 = jnp.zeros((T, Hp), f32)
    for b in range(B):
        h1 = jnp.tanh(u1[b * T:(b + 1) * T, :]
                      + jnp.dot(h1, whh1, preferred_element_type=f32))
        h2 = jnp.tanh(jnp.dot(h1, wih2, preferred_element_type=f32)
                      + jnp.dot(h2, whh2, preferred_element_type=f32))
        h2all_ref[pl.ds(b * T, T), :] = h2

    flat = h2all_ref[...]                 # (B*T, Hp), row index = b*T + t

    # BatchNorm1d over channels H with batch statistics (training-mode forward), eps=1e-5
    mean = jnp.mean(flat, axis=0, keepdims=True)
    var = jnp.mean((flat - mean) ** 2, axis=0, keepdims=True)
    yb = (flat - mean) * jax.lax.rsqrt(var + 1e-5) * gamma_ref[...] + beta_ref[...]

    # Linear(H -> n_mels) + ReLU, Linear(n_mels -> n_mels) + Sigmoid
    hfc = jnp.maximum(jnp.dot(yb, w1_ref[...], preferred_element_type=f32)
                      + b1_ref[...], 0.0)                              # (B*T, Mp)
    mask = jax.nn.sigmoid(jnp.dot(hfc, w2_ref[...], preferred_element_type=f32)
                          + b2_ref[...])                               # (B*T, Mp)

    # Inverse mel: least-squares (pinv) reconstruction, clamped non-negative.
    # TODO(synk): torchaudio InverseMelScale(max_iter=0) is a degenerate SGD loop with a
    # random init; replaced with the deterministic pinv least-squares solution.
    spec_mask = jnp.maximum(jnp.dot(mask, ifb_ref[...],
                                    preferred_element_type=f32), 0.0)  # (B*T, Fp)

    # Complex-mask multiply -> one lane-dense (2, B*T, Fp) output slab
    out_ref[0, :, :] = xr * spec_mask
    out_ref[1, :, :] = xi * spec_mask


# ----------------------------------------------------------------------------
# Wrapper (glue: layout transposes, lane padding, parameter plumbing)
# ----------------------------------------------------------------------------
def mel_rnn_forward(inputs, params):
    # inputs: (B, 1, n_stft, T, 2) float32
    B, _, n_stft, T, _ = inputs.shape
    Fp = params["fb"].shape[0]
    Hp = params["whh1_t"].shape[0]

    # (B, 1, n_stft, T, 2) -> two (B*T, n_stft) slabs (row = b*T + t), pad freq -> Fp,
    # stack real/imag into one slab so the kernel sees a single lane-dense input.
    xr = jnp.transpose(inputs[:, 0, :, :, 0], (0, 2, 1)).reshape(B * T, n_stft)
    xi = jnp.transpose(inputs[:, 0, :, :, 1], (0, 2, 1)).reshape(B * T, n_stft)
    pad = ((0, 0), (0, Fp - n_stft))
    xri = jnp.stack([jnp.pad(xr, pad), jnp.pad(xi, pad)], axis=0)      # (2, B*T, Fp)

    vmem = pl.BlockSpec(memory_space=pltpu.MemorySpace.VMEM)
    args = (xri, params["fb"], params["ifb"],
            params["wih1_t"], params["whh1_t"], params["wih2_t"], params["whh2_t"],
            params["gamma"], params["beta"],
            params["w1_t"], params["b1"], params["w2_t"], params["b2"])

    # TODO(synk): for production-length audio add a T-axis grid (parallel semantics for
    # v7x's 2 TCs); that requires a two-pass BatchNorm (stats pass + normalize pass).
    out = pl.pallas_call(
        functools.partial(melrnn_kernel, B=B, T=T),
        out_shape=jax.ShapeDtypeStruct((2, B * T, Fp), jnp.float32),
        in_specs=[vmem] * len(args),
        out_specs=vmem,
        scratch_shapes=[pltpu.VMEM((B * T, Hp), jnp.float32)],
    )(*args)

    # (2, B*T, Fp) -> (B, 1, n_stft, T, 2)
    out = out[:, :, :n_stft].reshape(2, B, T, n_stft)
    out = jnp.transpose(out, (1, 3, 2, 0))[:, None]
    return out


def init_params(key, n_stft, n_mels, hidden, sample_rate, f_min, f_max):
    Fp = _round_up(n_stft, 128)
    Mp = _round_up(n_mels, 128)
    Hp = _round_up(hidden, 128)
    ks = jax.random.split(key, 8)

    def u(k, shape, fan_in):
        bound = 1.0 / np.sqrt(fan_in)
        return jax.random.uniform(k, shape, jnp.float32, -bound, bound)

    def pad2(x, rows, cols):
        x = jnp.asarray(x, jnp.float32)
        return jnp.pad(x, ((0, rows - x.shape[0]), (0, cols - x.shape[1])))

    # PyTorch shapes: RNN W_ih (H, in), W_hh (H, H); Linear W (out, in).
    # Stored pre-transposed (in, out) and zero-padded to lane-dense 128 multiples
    # (zero padding keeps padded channels identically zero / inert through the net).
    wih1 = u(ks[0], (hidden, n_mels), hidden).T     # (n_mels, H)
    whh1 = u(ks[1], (hidden, hidden), hidden).T
    wih2 = u(ks[2], (hidden, hidden), hidden).T
    whh2 = u(ks[3], (hidden, hidden), hidden).T
    w1 = u(ks[4], (n_mels, hidden), hidden).T       # (H, n_mels)
    b1 = u(ks[5], (1, n_mels), hidden)
    w2 = u(ks[6], (n_mels, n_mels), n_mels).T
    b2 = u(ks[7], (1, n_mels), n_mels)

    # BatchNorm affine params (PyTorch defaults); padded gamma = 0 keeps pad channels 0.
    gamma = jnp.concatenate([jnp.ones((1, hidden), jnp.float32),
                             jnp.zeros((1, Hp - hidden), jnp.float32)], axis=1)
    beta = jnp.zeros((1, Hp), jnp.float32)

    fb = mel_filterbank(n_stft, n_mels, sample_rate, f_min, f_max)   # (n_stft, n_mels)
    ifb = np.linalg.pinv(fb).astype(np.float32)                      # (n_mels, n_stft)

    return dict(
        fb=pad2(fb, Fp, Mp), ifb=pad2(ifb, Mp, Fp),
        wih1_t=pad2(wih1, Mp, Hp), whh1_t=pad2(whh1, Hp, Hp),
        wih2_t=pad2(wih2, Hp, Hp), whh2_t=pad2(whh2, Hp, Hp),
        gamma=gamma, beta=beta,
        w1_t=pad2(w1, Hp, Mp), b1=pad2(b1, 1, Mp),
        w2_t=pad2(w2, Mp, Mp), b2=pad2(b2, 1, Mp),
    )


if __name__ == "__main__":
    # Small shapes consistent with the module's forward:
    B, T = 2, 8
    n_fft, n_mels, hidden = 32, 16, 32
    n_stft = n_fft // 2 + 1          # 17
    sample_rate, f_min, f_max = 16000, 100, 8000

    key = jax.random.PRNGKey(0)
    k_in, k_par = jax.random.split(key)
    inputs = jax.random.normal(k_in, (B, 1, n_stft, T, 2), jnp.float32)
    params = init_params(k_par, n_stft, n_mels, hidden, sample_rate, f_min, f_max)

    out = mel_rnn_forward(inputs, params)
    out = jax.block_until_ready(out)
    assert out.shape == (B, 1, n_stft, T, 2)
    assert bool(jnp.all(jnp.isfinite(out)))
    print("KERNEL_OK")
</pallas_src>

<mosaic_0001>
module attributes {stable_mosaic.version = 11 : i64} {
  func.func @melrnn_kernel(%arg0: memref<2x16x128xf32, #tpu.memory_space<vmem>>, %arg1: memref<128x128xf32, #tpu.memory_space<vmem>>, %arg2: memref<128x128xf32, #tpu.memory_space<vmem>>, %arg3: memref<128x128xf32, #tpu.memory_space<vmem>>, %arg4: memref<128x128xf32, #tpu.memory_space<vmem>>, %arg5: memref<128x128xf32, #tpu.memory_space<vmem>>, %arg6: memref<128x128xf32, #tpu.memory_space<vmem>>, %arg7: memref<1x128xf32, #tpu.memory_space<vmem>>, %arg8: memref<1x128xf32, #tpu.memory_space<vmem>>, %arg9: memref<128x128xf32, #tpu.memory_space<vmem>>, %arg10: memref<1x128xf32, #tpu.memory_space<vmem>>, %arg11: memref<128x128xf32, #tpu.memory_space<vmem>>, %arg12: memref<1x128xf32, #tpu.memory_space<vmem>>, %arg13: memref<2x16x128xf32, #tpu.memory_space<vmem>>, %arg14: memref<16x128xf32, #tpu.memory_space<vmem>>) attributes {dimension_semantics = [], scalar_prefetch = 0 : i64, scratch_operands = 1 : i64, tpu.core_type = #tpu.core_type<tc>} {
    %c0 = arith.constant 0 : index
    %c0_0 = arith.constant 0 : index
    %c0_1 = arith.constant 0 : index
    %0 = vector.load %arg0[%c0, %c0_0, %c0_1] : memref<2x16x128xf32, #tpu.memory_space<vmem>>, vector<1x16x128xf32>
    %1 = vector.shape_cast %0 : vector<1x16x128xf32> to vector<16x128xf32>
    %c1 = arith.constant 1 : index
    %c0_2 = arith.constant 0 : index
    %c0_3 = arith.constant 0 : index
    %2 = vector.load %arg0[%c1, %c0_2, %c0_3] : memref<2x16x128xf32, #tpu.memory_space<vmem>>, vector<1x16x128xf32>
    %3 = vector.shape_cast %2 : vector<1x16x128xf32> to vector<16x128xf32>
    %4 = arith.mulf %1, %1 : vector<16x128xf32>
    %5 = arith.mulf %3, %3 : vector<16x128xf32>
    %6 = arith.subf %4, %5 : vector<16x128xf32>
    %7 = math.absf %6 : vector<16x128xf32>
    %cst = arith.constant 0.000000e+00 : f32
    %8 = vector.broadcast %cst : f32 to vector<16x128xf32>
    %9 = arith.cmpf ogt, %7, %8 : vector<16x128xf32>
    %cst_4 = arith.constant 1.000000e-30 : f32
    %10 = vector.broadcast %cst_4 : f32 to vector<16x128xf32>
    %11 = arith.maximumf %7, %10 : vector<16x128xf32>
    %12 = math.log %11 : vector<16x128xf32>
    %cst_5 = arith.constant 3.000000e-01 : f32
    %13 = vector.broadcast %cst_5 : f32 to vector<16x128xf32>
    %14 = arith.mulf %13, %12 : vector<16x128xf32>
    %15 = math.exp %14 : vector<16x128xf32>
    %cst_6 = arith.constant 0.000000e+00 : f32
    %16 = vector.broadcast %cst_6 : f32 to vector<16x128xf32>
    %17 = arith.select %9, %15, %16 : vector<16x128xi1>, vector<16x128xf32>
    %c0_7 = arith.constant 0 : index
    %c0_8 = arith.constant 0 : index
    %18 = vector.load %arg1[%c0_7, %c0_8] : memref<128x128xf32, #tpu.memory_space<vmem>>, vector<128x128xf32>
    %cst_9 = arith.constant dense<0.000000e+00> : vector<16x128xf32>
    %19 = tpu.matmul %17, %18, %cst_9 {dimension_numbers = #tpu.dot_dimension_numbers<[1], [0], [0], [1], [0, 0, 1, 1], [], []>} : vector<16x128xf32>, vector<128x128xf32>, vector<16x128xf32> -> vector<16x128xf32>
    %c0_10 = arith.constant 0 : index
    %c0_11 = arith.constant 0 : index
    %20 = vector.load %arg3[%c0_10, %c0_11] : memref<128x128xf32, #tpu.memory_space<vmem>>, vector<128x128xf32>
    %cst_12 = arith.constant dense<0.000000e+00> : vector<16x128xf32>
    %21 = tpu.matmul %19, %20, %cst_12 {dimension_numbers = #tpu.dot_dimension_numbers<[1], [0], [0], [1], [0, 0, 1, 1], [], []>} : vector<16x128xf32>, vector<128x128xf32>, vector<16x128xf32> -> vector<16x128xf32>
    %c0_13 = arith.constant 0 : index
    %c0_14 = arith.constant 0 : index
    %22 = vector.load %arg4[%c0_13, %c0_14] : memref<128x128xf32, #tpu.memory_space<vmem>>, vector<128x128xf32>
    %c0_15 = arith.constant 0 : index
    %c0_16 = arith.constant 0 : index
    %23 = vector.load %arg5[%c0_15, %c0_16] : memref<128x128xf32, #tpu.memory_space<vmem>>, vector<128x128xf32>
    %c0_17 = arith.constant 0 : index
    %c0_18 = arith.constant 0 : index
    %24 = vector.load %arg6[%c0_17, %c0_18] : memref<128x128xf32, #tpu.memory_space<vmem>>, vector<128x128xf32>
    %cst_19 = arith.constant 0.000000e+00 : f32
    %25 = vector.broadcast %cst_19 : f32 to vector<8x128xf32>
    %cst_20 = arith.constant 0.000000e+00 : f32
    %26 = vector.broadcast %cst_20 : f32 to vector<8x128xf32>
    %27 = vector.extract_strided_slice %21 {offsets = [0, 0], sizes = [8, 128], strides = [1, 1]} : vector<16x128xf32> to vector<8x128xf32>
    %cst_21 = arith.constant dense<0.000000e+00> : vector<8x128xf32>
    %28 = tpu.matmul %25, %22, %cst_21 {dimension_numbers = #tpu.dot_dimension_numbers<[1], [0], [0], [1], [0, 0, 1, 1], [], []>} : vector<8x128xf32>, vector<128x128xf32>, vector<8x128xf32> -> vector<8x128xf32>
    %29 = arith.addf %27, %28 : vector<8x128xf32>
    %30 = math.tanh %29 : vector<8x128xf32>
    %cst_22 = arith.constant dense<0.000000e+00> : vector<8x128xf32>
    %31 = tpu.matmul %30, %23, %cst_22 {dimension_numbers = #tpu.dot_dimension_numbers<[1], [0], [0], [1], [0, 0, 1, 1], [], []>} : vector<8x128xf32>, vector<128x128xf32>, vector<8x128xf32> -> vector<8x128xf32>
    %cst_23 = arith.constant dense<0.000000e+00> : vector<8x128xf32>
    %32 = tpu.matmul %26, %24, %cst_23 {dimension_numbers = #tpu.dot_dimension_numbers<[1], [0], [0], [1], [0, 0, 1, 1], [], []>} : vector<8x128xf32>, vector<128x128xf32>, vector<8x128xf32> -> vector<8x128xf32>
    %33 = arith.addf %31, %32 : vector<8x128xf32>
    %34 = math.tanh %33 : vector<8x128xf32>
    %c0_24 = arith.constant 0 : index
    %c0_25 = arith.constant 0 : index
    %35 = vector.load %arg14[%c0_24, %c0_25] : memref<16x128xf32, #tpu.memory_space<vmem>>, vector<8x128xf32>
    tpu.vector_store %arg14[%c0_24, %c0_25], %34 {strides = array<i32>} : memref<16x128xf32, #tpu.memory_space<vmem>>, vector<8x128xf32>,
    %36 = vector.extract_strided_slice %21 {offsets = [8, 0], sizes = [8, 128], strides = [1, 1]} : vector<16x128xf32> to vector<8x128xf32>
    %cst_26 = arith.constant dense<0.000000e+00> : vector<8x128xf32>
    %37 = tpu.matmul %30, %22, %cst_26 {dimension_numbers = #tpu.dot_dimension_numbers<[1], [0], [0], [1], [0, 0, 1, 1], [], []>} : vector<8x128xf32>, vector<128x128xf32>, vector<8x128xf32> -> vector<8x128xf32>
    %38 = arith.addf %36, %37 : vector<8x128xf32>
    %39 = math.tanh %38 : vector<8x128xf32>
    %cst_27 = arith.constant dense<0.000000e+00> : vector<8x128xf32>
    %40 = tpu.matmul %39, %23, %cst_27 {dimension_numbers = #tpu.dot_dimension_numbers<[1], [0], [0], [1], [0, 0, 1, 1], [], []>} : vector<8x128xf32>, vector<128x128xf32>, vector<8x128xf32> -> vector<8x128xf32>
    %cst_28 = arith.constant dense<0.000000e+00> : vector<8x128xf32>
    %41 = tpu.matmul %34, %24, %cst_28 {dimension_numbers = #tpu.dot_dimension_numbers<[1], [0], [0], [1], [0, 0, 1, 1], [], []>} : vector<8x128xf32>, vector<128x128xf32>, vector<8x128xf32> -> vector<8x128xf32>
    %42 = arith.addf %40, %41 : vector<8x128xf32>
    %43 = math.tanh %42 : vector<8x128xf32>
    %c8 = arith.constant 8 : index
    %c0_29 = arith.constant 0 : index
    %44 = vector.load %arg14[%c8, %c0_29] : memref<16x128xf32, #tpu.memory_space<vmem>>, vector<8x128xf32>
    tpu.vector_store %arg14[%c8, %c0_29], %43 {strides = array<i32>} : memref<16x128xf32, #tpu.memory_space<vmem>>, vector<8x128xf32>,
    %c0_30 = arith.constant 0 : index
    %c0_31 = arith.constant 0 : index
    %45 = vector.load %arg14[%c0_30, %c0_31] : memref<16x128xf32, #tpu.memory_space<vmem>>, vector<16x128xf32>
    %cst_32 = arith.constant dense<0.000000e+00> : vector<128xf32>
    %46 = vector.multi_reduction <add>, %45, %cst_32 [0] : vector<16x128xf32> to vector<128xf32>
    %47 = vector.shape_cast %46 : vector<128xf32> to vector<1x128xf32>
    %cst_33 = arith.constant 1.600000e+01 : f32
    %48 = vector.broadcast %cst_33 : f32 to vector<1x128xf32>
    %49 = arith.divf %47, %48 : vector<1x128xf32>
    %50 = vector.broadcast %49 : vector<1x128xf32> to vector<16x128xf32>
    %51 = arith.subf %45, %50 : vector<16x128xf32>
    %52 = arith.mulf %51, %51 : vector<16x128xf32>
    %cst_34 = arith.constant dense<0.000000e+00> : vector<128xf32>
    %53 = vector.multi_reduction <add>, %52, %cst_34 [0] : vector<16x128xf32> to vector<128xf32>
    %54 = vector.shape_cast %53 : vector<128xf32> to vector<1x128xf32>
    %cst_35 = arith.constant 1.600000e+01 : f32
    %55 = vector.broadcast %cst_35 : f32 to vector<1x128xf32>
    %56 = arith.divf %54, %55 : vector<1x128xf32>
    %57 = vector.broadcast %49 : vector<1x128xf32> to vector<16x128xf32>
    %58 = arith.subf %45, %57 : vector<16x128xf32>
    %cst_36 = arith.constant 9.99999974E-6 : f32
    %59 = vector.broadcast %cst_36 : f32 to vector<1x128xf32>
    %60 = arith.addf %56, %59 : vector<1x128xf32>
    %61 = math.rsqrt %60 : vector<1x128xf32>
    %62 = vector.broadcast %61 : vector<1x128xf32> to vector<16x128xf32>
    %63 = arith.mulf %58, %62 : vector<16x128xf32>
    %c0_37 = arith.constant 0 : index
    %c0_38 = arith.constant 0 : index
    %64 = vector.load %arg7[%c0_37, %c0_38] : memref<1x128xf32, #tpu.memory_space<vmem>>, vector<1x128xf32>
    %65 = vector.broadcast %64 : vector<1x128xf32> to vector<16x128xf32>
    %66 = arith.mulf %63, %65 : vector<16x128xf32>
    %c0_39 = arith.constant 0 : index
    %c0_40 = arith.constant 0 : index
    %67 = vector.load %arg8[%c0_39, %c0_40] : memref<1x128xf32, #tpu.memory_space<vmem>>, vector<1x128xf32>
    %68 = vector.broadcast %67 : vector<1x128xf32> to vector<16x128xf32>
    %69 = arith.addf %66, %68 : vector<16x128xf32>
    %c0_41 = arith.constant 0 : index
    %c0_42 = arith.constant 0 : index
    %70 = vector.load %arg9[%c0_41, %c0_42] : memref<128x128xf32, #tpu.memory_space<vmem>>, vector<128x128xf32>
    %cst_43 = arith.constant dense<0.000000e+00> : vector<16x128xf32>
    %71 = tpu.matmul %69, %70, %cst_43 {dimension_numbers = #tpu.dot_dimension_numbers<[1], [0], [0], [1], [0, 0, 1, 1], [], []>} : vector<16x128xf32>, vector<128x128xf32>, vector<16x128xf32> -> vector<16x128xf32>
    %c0_44 = arith.constant 0 : index
    %c0_45 = arith.constant 0 : index
    %72 = vector.load %arg10[%c0_44, %c0_45] : memref<1x128xf32, #tpu.memory_space<vmem>>, vector<1x128xf32>
    %73 = vector.broadcast %72 : vector<1x128xf32> to vector<16x128xf32>
    %74 = arith.addf %71, %73 : vector<16x128xf32>
    %cst_46 = arith.constant 0.000000e+00 : f32
    %75 = vector.broadcast %cst_46 : f32 to vector<16x128xf32>
    %76 = arith.maximumf %74, %75 : vector<16x128xf32>
    %c0_47 = arith.constant 0 : index
    %c0_48 = arith.constant 0 : index
    %77 = vector.load %arg11[%c0_47, %c0_48] : memref<128x128xf32, #tpu.memory_space<vmem>>, vector<128x128xf32>
    %cst_49 = arith.constant dense<0.000000e+00> : vector<16x128xf32>
    %78 = tpu.matmul %76, %77, %cst_49 {dimension_numbers = #tpu.dot_dimension_numbers<[1], [0], [0], [1], [0, 0, 1, 1], [], []>} : vector<16x128xf32>, vector<128x128xf32>, vector<16x128xf32> -> vector<16x128xf32>
    %c0_50 = arith.constant 0 : index
    %c0_51 = arith.constant 0 : index
    %79 = vector.load %arg12[%c0_50, %c0_51] : memref<1x128xf32, #tpu.memory_space<vmem>>, vector<1x128xf32>
    %80 = vector.broadcast %79 : vector<1x128xf32> to vector<16x128xf32>
    %81 = arith.addf %78, %80 : vector<16x128xf32>
    %82 = arith.negf %81 : vector<16x128xf32>
    %83 = math.exp %82 : vector<16x128xf32>
    %cst_52 = arith.constant 1.000000e+00 : f32
    %84 = vector.broadcast %cst_52 : f32 to vector<16x128xf32>
    %85 = arith.addf %84, %83 : vector<16x128xf32>
    %86 = arith.divf %84, %85 : vector<16x128xf32>
    %c0_53 = arith.constant 0 : index
    %c0_54 = arith.constant 0 : index
    %87 = vector.load %arg2[%c0_53, %c0_54] : memref<128x128xf32, #tpu.memory_space<vmem>>, vector<128x128xf32>
    %cst_55 = arith.constant dense<0.000000e+00> : vector<16x128xf32>
    %88 = tpu.matmul %86, %87, %cst_55 {dimension_numbers = #tpu.dot_dimension_numbers<[1], [0], [0], [1], [0, 0, 1, 1], [], []>} : vector<16x128xf32>, vector<128x128xf32>, vector<16x128xf32> -> vector<16x128xf32>
    %cst_56 = arith.constant 0.000000e+00 : f32
    %89 = vector.broadcast %cst_56 : f32 to vector<16x128xf32>
    %90 = arith.maximumf %88, %89 : vector<16x128xf32>
    %91 = arith.mulf %1, %90 : vector<16x128xf32>
    %c0_57 = arith.constant 0 : index
    %c0_58 = arith.constant 0 : index
    %c0_59 = arith.constant 0 : index
    %92 = vector.load %arg13[%c0_57, %c0_58, %c0_59] : memref<2x16x128xf32, #tpu.memory_space<vmem>>, vector<1x16x128xf32>
    %93 = vector.shape_cast %92 : vector<1x16x128xf32> to vector<16x128xf32>
    %94 = vector.shape_cast %91 : vector<16x128xf32> to vector<1x16x128xf32>
    tpu.vector_store %arg13[%c0_57, %c0_58, %c0_59], %94 {strides = array<i32>} : memref<2x16x128xf32, #tpu.memory_space<vmem>>, vector<1x16x128xf32>,
    %95 = arith.mulf %3, %90 : vector<16x128xf32>
    %c1_60 = arith.constant 1 : index
    %c0_61 = arith.constant 0 : index
    %c0_62 = arith.constant 0 : index
    %96 = vector.load %arg13[%c1_60, %c0_61, %c0_62] : memref<2x16x128xf32, #tpu.memory_space<vmem>>, vector<1x16x128xf32>
    %97 = vector.shape_cast %96 : vector<1x16x128xf32> to vector<16x128xf32>
    %98 = vector.shape_cast %95 : vector<16x128xf32> to vector<1x16x128xf32>
    tpu.vector_store %arg13[%c1_60, %c0_61, %c0_62], %98 {strides = array<i32>} : memref<2x16x128xf32, #tpu.memory_space<vmem>>, vector<1x16x128xf32>,
    return
  }
}

</mosaic_0001>

<bundles_post_ra>
// kernel: tpu_custom_call.1
= control target key start
LH: loop header
LB: loop body
LE: loop exit
PB: predicated region body
PF: predicated region fallthrough
CT: control target
= control target key end

     0   :  { %18 = vsyncpa [#allocation4], 0  ;;  %s1322_s0 = inlined_call_operand.hbm [shape: f32[2,16,128], index: 0, kind: input, shape index: {}]   ;;  %s1323_s1 = inlined_call_operand.hbm [shape: f32[128,128], index: 1, kind: input, shape index: {}]   ;;  %s1324_s2 = inlined_call_operand.hbm [shape: f32[128,128], index: 2, kind: input, shape index: {}]   ;;  %s1325_s3 = inlined_call_operand.hbm [shape: f32[128,128], index: 3, kind: input, shape index: {}]   ;;  %s1326_s4 = inlined_call_operand.hbm [shape: f32[128,128], index: 4, kind: input, shape index: {}]   ;;  %s1327_s5 = inlined_call_operand.hbm [shape: f32[128,128], index: 5, kind: input, shape index: {}]   ;;  %s1328_s6 = inlined_call_operand.hbm [shape: f32[128,128], index: 6, kind: input, shape index: {}]   ;;  %s1329_s7 = inlined_call_operand.vmem [shape: f32[1,128], index: 7, kind: input, shape index: {}]   ;;  %s1330_s8 = inlined_call_operand.vmem [shape: f32[1,128], index: 8, kind: input, shape index: {}]   ;;  %s1331_s9 = inlined_call_operand.hbm [shape: f32[128,128], index: 9, kind: input, shape index: {}]   ;;  %s1332_s10 = inlined_call_operand.vmem [shape: f32[1,128], index: 10, kind: input, shape index: {}]   ;;  %s1333_s11 = inlined_call_operand.hbm [shape: f32[128,128], index: 11, kind: input, shape index: {}]   ;;  %s1334_s12 = inlined_call_operand.vmem [shape: f32[1,128], index: 12, kind: input, shape index: {}]   ;;  %s1335_s13 = inlined_call_operand.hbm [shape: f32[2,16,128], index: 13, kind: output, shape index: {}]  }
   0x1   :  { %19 = vsyncpa [#allocation7], 0 }
   0x2   :  { %20 = vsyncpa [#allocation10], 0 }
   0x3   :  { %21 = vsyncpa [#allocation13], 0 }
   0x4   :  { %22 = vsyncpa [#allocation16], 0 }
   0x5   :  { %23 = vsyncpa [#allocation5], 0  ;;  %s41_s27 = sshll.u32 %s1323_s1, 4  ;;  %s1039_s28 = smov [#allocation6]   ;;  %s42_s27 = int_to_ptr.hbm [resolvable:$true] %s41_s27 }
   0x6   :  { %s43_s29 = sshll.u32 %s1039_s28, 4  ;;  %s67_s15 = sshll.u32 %s1325_s3, 4  ;;  %s44_s29 = int_to_ptr.vmem [resolvable:$true] %s43_s29  ;;  %s68_s15 = int_to_ptr.hbm [resolvable:$true] %s67_s15 }
   0x7   :  { %s1040_s16 = smov 128   ;;  %s1041_s17 = smov 8  }
   0x8   :  { %49 = dma.hbm_to_vmem [thread:$0]  %s42_s27, 2048, %s44_s29, [#allocation7], %s1040_s16, %s1040_s16, %s1041_s17  }
   0x9   :  { %s1042_s18 = smov [#allocation9]   ;;  %s93_s1 = sshll.u32 %s1327_s5, 4  ;;  %s94_s1 = int_to_ptr.hbm [resolvable:$true] %s93_s1 }
   0xa   :  { %s69_s19 = sshll.u32 %s1042_s18, 4  ;;  %s123_s23 = sshll.u32 %s1331_s9, 4  ;;  %s70_s19 = int_to_ptr.vmem [resolvable:$true] %s69_s19  ;;  %s124_s23 = int_to_ptr.hbm [resolvable:$true] %s123_s23 }
   0xb   :  { %75 = dma.hbm_to_vmem [thread:$0]  %s68_s15, 2048, %s70_s19, [#allocation10], %s1040_s16, %s1040_s16, %s1041_s17  }
   0xc   :  { %s1043_s24 = smov [#allocation12]   ;;  %s1044_s26 = smov [#allocation15]  }
   0xd   :  { %s95_s25 = sshll.u32 %s1043_s24, 4  ;;  %s125_s5 = sshll.u32 %s1044_s26, 4  ;;  %s96_s25 = int_to_ptr.vmem [resolvable:$true] %s95_s25  ;;  %s126_s5 = int_to_ptr.vmem [resolvable:$true] %s125_s5 }
   0xe   :  { %101 = dma.hbm_to_vmem [thread:$0]  %s94_s1, 2048, %s96_s25, [#allocation13], %s1040_s16, %s1040_s16, %s1041_s17  }
   0xf   :  { %s28_s29 = sshll.u32 %s1322_s0, 4  ;;  %s54_s14 = sshll.u32 %s1324_s2, 4  ;;  %s29_s29 = int_to_ptr.hbm [resolvable:$true] %s28_s29  ;;  %s55_s14 = int_to_ptr.hbm [resolvable:$true] %s54_s14 }
  0x10   :  { %131 = dma.hbm_to_vmem [thread:$0]  %s124_s23, 2048, %s126_s5, [#allocation16], %s1040_s16, %s1040_s16, %s1041_s17  }
  0x11   :  { %s1045_s15 = smov [#allocation3]   ;;  %s1046_s19 = smov [#allocation8]  }
  0x12   :  { %s30_s18 = sshll.u32 %s1045_s15, 4  ;;  %s56_s0 = sshll.u32 %s1046_s19, 4  ;;  %s31_s18 = int_to_ptr.vmem [resolvable:$true] %s30_s18  ;;  %s57_s0 = int_to_ptr.vmem [resolvable:$true] %s56_s0 }
  0x13   :  { %36 = dma.hbm_to_vmem [thread:$0]  %s29_s29, 512, %s31_s18, [#allocation4], %s1040_s16, %s1040_s16, %s1041_s17  }
  0x14   :  { %s80_s1 = sshll.u32 %s1326_s4, 4  ;;  %s106_s22 = sshll.u32 %s1328_s6, 4  ;;  %s81_s1 = int_to_ptr.hbm [resolvable:$true] %s80_s1  ;;  %s107_s22 = int_to_ptr.hbm [resolvable:$true] %s106_s22 }
  0x15   :  { %62 = dma.hbm_to_vmem [thread:$0]  %s55_s14, 2048, %s57_s0, [#allocation7], %s1040_s16, %s1040_s16, %s1041_s17  }
  0x16   :  { %s1047_s23 = smov [#allocation11]   ;;  %s1048_s25 = smov [#allocation14]  }
  0x17   :  { %s82_s24 = sshll.u32 %s1047_s23, 4  ;;  %s108_s4 = sshll.u32 %s1048_s25, 4  ;;  %s83_s24 = int_to_ptr.vmem [resolvable:$true] %s82_s24  ;;  %s109_s4 = int_to_ptr.vmem [resolvable:$true] %s108_s4 }
  0x18   :  { %88 = dma.hbm_to_vmem [thread:$0]  %s81_s1, 2048, %s83_s24, [#allocation10], %s1040_s16, %s1040_s16, %s1041_s17  }
  0x19   :  { %s138_s27 = sshll.u32 %s1333_s11, 4  ;;  %s1049_s6 = smov [#allocation17]   ;;  %s139_s27 = int_to_ptr.hbm [resolvable:$true] %s138_s27 }
  0x1a   :  { %114 = dma.hbm_to_vmem [thread:$0]  %s107_s22, 2048, %s109_s4, [#allocation13], %s1040_s16, %s1040_s16, %s1041_s17  }
  0x1b   :  { %s140_s28 = sshll.u32 %s1049_s6, 4  ;;  %s141_s28 = int_to_ptr.vmem [resolvable:$true] %s140_s28 }
  0x1c   :  { %146 = dma.hbm_to_vmem [thread:$0]  %s139_s27, 2048, %s141_s28, [#allocation16], %s1040_s16, %s1040_s16, %s1041_s17  }
  0x1d   :  { %1027 = dma.done.wait [#allocation4], 512  }
  0x1e   :  { %1028 = vsyncadd [#allocation4], 4294966784 }
  0x1f   :  { %1029 = dma.done.wait [#allocation7], 4096  }
  0x20   :  { %1030 = vsyncadd [#allocation7], 4294963200 }
  0x21   :  { %1031 = dma.done.wait [#allocation10], 4096  }
  0x22   :  { %1032 = vsyncadd [#allocation10], 4294963200 }
  0x23   :  { %1033 = dma.done.wait [#allocation13], 4096  }
  0x24   :  { %1034 = vsyncadd [#allocation13], 4294963200 }
  0x25   :  { %1035 = dma.done.wait [#allocation16], 4096  }
  0x26   :  { %1036 = vsyncadd [#allocation16], 4294963200  ;;  %v229_v0 = vld [vmem:[#allocation6 + $0x78] sm:$0xff]  ;;  %v228_v1 = vld [vmem:[#allocation6 + $0x70] sm:$0xff]  ;;  %s704_s0 = sshll.u32 %s1335_s13, 4  ;;  %s705_s0 = int_to_ptr.hbm [resolvable:$true] %s704_s0 }
  0x27   :  { %230 = vmatpush.msra.mxu3 %v229_v0  ;;  %v227_v2 = vld [vmem:[#allocation6 + $0x68] sm:$0xff]  ;;  %v226_v3 = vld [vmem:[#allocation6 + $0x60] sm:$0xff]  ;;  %v1179_v5 = vld [vmem:[#allocation3 + $0x10] sm:$0xff] }
  0x28   :  { %v1177_v4 = vld [vmem:[#allocation3] sm:$0xff]  ;;  %v225_v6 = vld [vmem:[#allocation6 + $0x58] sm:$0xff]  ;;  %v192_v8 = vmul.f32 %v1179_v5, %v1179_v5  ;;  %v1187_v10 = vld [vmem:[#allocation11 + $0x70] sm:$0xff] }
  0x29   :  { %231 = vmatpush.msra.mxu3 %v228_v1  ;;  %v190_v7 = vmul.f32 %v1177_v4, %v1177_v4  ;;  %v1185_v9 = vld [vmem:[#allocation11 + $0x78] sm:$0xff]  ;;  %v267_v12 = vld [vmem:[#allocation9 + $0x70] sm:$0xff]  ;;  %v1190_v15 = vld [vmem:[#allocation11 + $0x68] sm:$0xff] }
  0x2a   :  { %340 = vmatpush.msra.mxu2 %v1185_v9  ;;  %v268_v11 = vld [vmem:[#allocation9 + $0x78] sm:$0xff]  ;;  %v224_v13 = vld [vmem:[#allocation6 + $0x50] sm:$0xff]  ;;  %v266_v16 = vld [vmem:[#allocation9 + $0x68] sm:$0xff] }
  0x2b   :  { %232 = vmatpush.msra.mxu3 %v227_v2  ;;  %v194_v14 = vsub.f32 %v190_v7, %v192_v8  ;;  %269 = vmatpush.msra.mxu1 %v268_v11  ;;  %v223_v17 = vld [vmem:[#allocation6 + $0x48] sm:$0xff]  ;;  %v1195_v19 = vld [vmem:[#allocation11 + $0x60] sm:$0xff]  ;;  %v1199_v23 = vld [vmem:[#allocation11 + $0x58] sm:$0xff]  ;;  %v1050_v8 = vmov 0.0  }
  0x2c   :  { %341 = vmatpush.msra.mxu2 %v1187_v10  ;;  %v265_v20 = vld [vmem:[#allocation9 + $0x60] sm:$0xff]  ;;  %v264_v24 = vld [vmem:[#allocation9 + $0x58] sm:$0xff]  ;;  %v1202_v26 = vld [vmem:[#allocation11 + $0x50] sm:$0xff] }
  0x2d   :  { %233 = vmatpush.msra.mxu3 %v226_v3  ;;  %v1193_v18 = vand.u32 2147483647, %v194_v14  ;;  %270 = vmatpush.msra.mxu1 %v267_v12  ;;  %v222_v21 = vld [vmem:[#allocation6 + $0x40] sm:$0xff]  ;;  %v221_v25 = vld [vmem:[#allocation6 + $0x38] sm:$0xff]  ;;  %v220_v27 = vld [vmem:[#allocation6 + $0x30] sm:$0xff] }
  0x2e   :  { %342 = vmatpush.msra.mxu2 %v1190_v15  ;;  %v263_v28 = vld [vmem:[#allocation9 + $0x50] sm:$0xff]  ;;  %v1205_v29 = vld [vmem:[#allocation3 + $0x8] sm:$0xff]  ;;  %v1209_v32 = vld [vmem:[#allocation3 + $0x18] sm:$0xff] }
  0x2f   :  { %234 = vmatpush.msra.mxu3 %v225_v6  ;;  %v200_v22 = vmax.f32 %v1193_v18, 1e-30  ;;  %271 = vmatpush.msra.mxu1 %v266_v16  ;;  %v1207_v30 = vld [vmem:[#allocation11 + $0x48] sm:$0xff]  ;;  %v191_v33 = vmul.f32 %v1205_v29, %v1205_v29  ;;  %v193_v34 = vmul.f32 %v1209_v32, %v1209_v32  ;;  %v1216_v36 = vld [vmem:[#allocation11 + $0x40] sm:$0xff]  ;;  %v1219_v41 = vld [vmem:[#allocation11 + $0x38] sm:$0xff]  ;;  %vm198_vm0 = vcmp.gt.f32.partialorder %v1193_v18, 0.0 }
  0x30   :  { %343 = vmatpush.msra.mxu2 %v1195_v19  ;;  %v262_v31 = vld [vmem:[#allocation9 + $0x48] sm:$0xff]  ;;  %v261_v37 = vld [vmem:[#allocation9 + $0x40] sm:$0xff]  ;;  %v260_v43 = vld [vmem:[#allocation9 + $0x38] sm:$0xff] }
  0x31   :  { %235 = vmatpush.msra.mxu3 %v224_v13  ;;  %759 = vlog2.f32 %v200_v22  ;;  %272 = vmatpush.msra.mxu1 %v265_v20  ;;  %v219_v35 = vld [vmem:[#allocation6 + $0x28] sm:$0xff]  ;;  %v195_v38 = vsub.f32 %v191_v33, %v193_v34  ;;  %v218_v40 = vld [vmem:[#allocation6 + $0x20] sm:$0xff]  ;;  %v217_v45 = vld [vmem:[#allocation6 + $0x18] sm:$0xff] }
  0x32   :  { %344 = vmatpush.msra.mxu2 %v1199_v23  ;;  %v1222_v46 = vld [vmem:[#allocation11 + $0x30] sm:$0xff]  ;;  %v1225_v51 = vld [vmem:[#allocation11 + $0x28] sm:$0xff]  ;;  %v1228_v55 = vld [vmem:[#allocation11 + $0x20] sm:$0xff] }
  0x33   :  { %236 = vmatpush.msra.mxu3 %v223_v17  ;;  %273 = vmatpush.msra.mxu1 %v264_v24  ;;  %v197_v44 = vand.u32 2147483647, %v195_v38  ;;  %v259_v48 = vld [vmem:[#allocation9 + $0x30] sm:$0xff]  ;;  %v258_v53 = vld [vmem:[#allocation9 + $0x28] sm:$0xff]  ;;  %v257_v56 = vld [vmem:[#allocation9 + $0x20] sm:$0xff] }
  0x34   :  { %345 = vmatpush.msra.mxu2 %v1202_v26  ;;  %v216_v50 = vld [vmem:[#allocation6 + $0x10] sm:$0xff]  ;;  %v215_v54 = vld [vmem:[#allocation6 + $0x8] sm:$0xff]  ;;  %v214_v57 = vld [vmem:[#allocation6] sm:$0xff] }
  0x35   :  { %237 = vmatpush.msra.mxu3 %v222_v21  ;;  %274 = vmatpush.msra.mxu1 %v263_v28  ;;  %v201_v49 = vmax.f32 %v197_v44, 1e-30  ;;  %v1231_v58 = vld [vmem:[#allocation11 + $0x18] sm:$0xff]  ;;  %v1234_v60 = vld [vmem:[#allocation11 + $0x10] sm:$0xff]  ;;  %v1238_v63 = vld [vmem:[#allocation11 + $0x8] sm:$0xff]  ;;  %vm199_vm1 = vcmp.gt.f32.partialorder %v197_v44, 0.0 }
  0x36   :  { %346 = vmatpush.msra.mxu2 %v1207_v30  ;;  %v256_v59 = vld [vmem:[#allocation9 + $0x18] sm:$0xff]  ;;  %v255_v62 = vld [vmem:[#allocation9 + $0x10] sm:$0xff]  ;;  %v254_v2 = vld [vmem:[#allocation9 + $0x8] sm:$0xff] }
  0x37   :  { %238 = vmatpush.msra.mxu3 %v221_v25  ;;  %v760_v39 = vpop.eup %759  ;;  %275 = vmatpush.msra.mxu1 %v262_v31  ;;  %761 = vlog2.f32 %v201_v49  ;;  %v1241_v3 = vld [vmem:[#allocation11] sm:$0xff]  ;;  %v339_v13 = vld [vmem:[#allocation14 + $0x78] sm:$0xff]  ;;  %v338_v14 = vld [vmem:[#allocation14 + $0x70] sm:$0xff] }
  0x38   :  { %v203_v42 = vmul.f32 0.6931472, %v760_v39  ;;  %347 = vmatpush.msra.mxu2 %v1216_v36  ;;  %v253_v12 = vld [vmem:[#allocation9] sm:$0xff]  ;;  %v1247_v16 = vld [vmem:[#allocation12 + $0x78] sm:$0xff]  ;;  %v337_v17 = vld [vmem:[#allocation14 + $0x68] sm:$0xff] }
  0x39   :  { %239 = vmatpush.msra.mxu3 %v220_v27  ;;  %276 = vmatpush.msra.mxu1 %v261_v37  ;;  %v1250_v18 = vld [vmem:[#allocation12 + $0x70] sm:$0xff]  ;;  %v1253_v20 = vld [vmem:[#allocation12 + $0x68] sm:$0xff]  ;;  %v336_v21 = vld [vmem:[#allocation14 + $0x60] sm:$0xff] }
  0x3a   :  { %v206_v47 = vmul.f32 0.3, %v203_v42  ;;  %348 = vmatpush.msra.mxu2 %v1219_v41  ;;  %382 = vmatpush.msra.mxu0 %v1247_v16  ;;  %v335_v22 = vld [vmem:[#allocation14 + $0x58] sm:$0xff]  ;;  %v334_v24 = vld [vmem:[#allocation14 + $0x50] sm:$0xff]  ;;  %v333_v25 = vld [vmem:[#allocation14 + $0x48] sm:$0xff] }
  0x3b   :  { %240 = vmatpush.msra.mxu3 %v219_v35  ;;  %277 = vmatpush.msra.mxu1 %v260_v43  ;;  %v332_v27 = vld [vmem:[#allocation14 + $0x40] sm:$0xff]  ;;  %v331_v28 = vld [vmem:[#allocation14 + $0x38] sm:$0xff]  ;;  %v330_v31 = vld [vmem:[#allocation14 + $0x30] sm:$0xff] }
  0x3c   :  { %v208_v52 = vmul.f32 1.442695, %v206_v47  ;;  %349 = vmatpush.msra.mxu2 %v1222_v46  ;;  %383 = vmatpush.msra.mxu0 %v1250_v18  ;;  %v314_v33 = vld [vmem:[#allocation12 + $0x30] sm:$0xff]  ;;  %v313_v34 = vld [vmem:[#allocation12 + $0x28] sm:$0xff]  ;;  %v328_v35 = vld [vmem:[#allocation14 + $0x20] sm:$0xff] }
  0x3d   :  { %241 = vmatpush.msra.mxu3 %v218_v40  ;;  %278 = vmatpush.msra.mxu1 %v259_v48  ;;  %v762_v61 = vpop.eup %761  ;;  %v326_v37 = vld [vmem:[#allocation14 + $0x10] sm:$0xff]  ;;  %v325_v39 = vld [vmem:[#allocation14 + $0x8] sm:$0xff]  ;;  %v312_v40 = vld [vmem:[#allocation12 + $0x20] sm:$0xff] }
  0x3e   :  { %763 = vpow2.f32 %v208_v52  ;;  %350 = vmatpush.msra.mxu2 %v1225_v51  ;;  %v205_v0 = vmul.f32 0.6931472, %v762_v61  ;;  %384 = vmatpush.msra.mxu0 %v1253_v20  ;;  %v324_v42 = vld [vmem:[#allocation14] sm:$0xff]  ;;  %v311_v43 = vld [vmem:[#allocation12 + $0x18] sm:$0xff]  ;;  %v310_v44 = vld [vmem:[#allocation12 + $0x10] sm:$0xff] }
  0x3f   :  { %242 = vmatpush.msra.mxu3 %v217_v45  ;;  %279 = vmatpush.msra.mxu1 %v258_v53  ;;  %v309_v45 = vld [vmem:[#allocation12 + $0x8] sm:$0xff]  ;;  %v536_v61 = vld [vmem:[#allocation15 + $0x70] sm:$0xff] }
  0x40   :  { %351 = vmatpush.msra.mxu2 %v1228_v55  ;;  %v207_v6 = vmul.f32 0.3, %v205_v0 }
  0x41   :  { %243 = vmatpush.msra.mxu3 %v216_v50  ;;  %280 = vmatpush.msra.mxu1 %v257_v56 }
  0x42   :  { %352 = vmatpush.msra.mxu2 %v1231_v58  ;;  %v210_v7 = vmul.f32 1.442695, %v207_v6  ;;  %v533_v6 = vld [vmem:[#allocation15 + $0x58] sm:$0xff] }
  0x43   :  { %244 = vmatpush.msra.mxu3 %v215_v54  ;;  %281 = vmatpush.msra.mxu1 %v256_v59  ;;  %v1051_v59 = vmov 16.0  }
  0x44   :  { %v764_v1 = vpop.eup %763  ;;  %353 = vmatpush.msra.mxu2 %v1234_v60  ;;  %765 = vpow2.f32 %v210_v7  ;;  %v532_v7 = vld [vmem:[#allocation15 + $0x50] sm:$0xff] }
  0x45   :  { %245 = vmatpush.msra.mxu3 %v214_v57  ;;  %282 = vmatpush.msra.mxu1 %v255_v62  ;;  %v535_v62 = vld [vmem:[#allocation15 + $0x68] sm:$0xff] }
  0x46   :  { %721 = vmatmul.msk.f32.vlgmr.msra.gmra.mxu3 %vm198_vm0, %v764_v1  ;;  %354 = vmatpush.msra.mxu2 %v1238_v63  ;;  %v534_v1 = vld [vmem:[#allocation15 + $0x60] sm:$0xff] }
  0x47   :  { %283 = vmatpush.msra.mxu1 %v254_v2  ;;  %362 = vmatpush.msrb.mxu3 %v339_v13 }
  0x48   :  { %355 = vmatpush.msra.mxu2 %v1241_v3 }
  0x49   :  { %356 = vmatmul.f32.vlgmr.msra.gmra.mxu2 %v1050_v8  ;;  %284 = vmatpush.msra.mxu1 %v253_v12  ;;  %v530_v12 = vld [vmem:[#allocation15 + $0x40] sm:$0xff] }
  0x4a   :  { %v766_v11 = vpop.eup %765  ;;  %426 = vmatpush.msrb.mxu2 %v339_v13  ;;  %363 = vmatpush.msrb.mxu3 %v338_v14 }
  0x4b   :  { %404 = vmatpush.msrb.mxu1 %v1185_v9  ;;  %v1257_v9 = vld [vmem:[#allocation12 + $0x60] sm:$0xff] }
  0x4c   :  { %427 = vmatpush.msrb.mxu2 %v338_v14  ;;  %364 = vmatpush.msrb.mxu3 %v337_v17 }
  0x4d   :  { %405 = vmatpush.msrb.mxu1 %v1187_v10  ;;  %v1261_v10 = vld [vmem:[#allocation12 + $0x58] sm:$0xff]  ;;  %385 = vmatpush.msra.mxu0 %v1257_v9 }
  0x4e   :  { %722 = vmatmul.msk.f32.gmra.mxu3 %vm199_vm1, %v766_v11  ;;  %428 = vmatpush.msrb.mxu2 %v337_v17  ;;  %v531_v11 = vld [vmem:[#allocation15 + $0x48] sm:$0xff]  ;;  %v529_v17 = vld [vmem:[#allocation15 + $0x38] sm:$0xff] }
  0x4f   :  { %406 = vmatpush.msrb.mxu1 %v1190_v15  ;;  %365 = vmatpush.msrb.mxu3 %v336_v21  ;;  %v1265_v15 = vld [vmem:[#allocation12 + $0x50] sm:$0xff] }
  0x50   :  { %429 = vmatpush.msrb.mxu2 %v336_v21  ;;  %386 = vmatpush.msra.mxu0 %v1261_v10 }
  0x51   :  { %407 = vmatpush.msrb.mxu1 %v1195_v19  ;;  %366 = vmatpush.msrb.mxu3 %v335_v22  ;;  %v1269_v19 = vld [vmem:[#allocation12 + $0x48] sm:$0xff] }
  0x52   :  { %430 = vmatpush.msrb.mxu2 %v335_v22  ;;  %387 = vmatpush.msra.mxu0 %v1265_v15  ;;  %v527_v22 = vld [vmem:[#allocation15 + $0x28] sm:$0xff] }
  0x53   :  { %408 = vmatpush.msrb.mxu1 %v1199_v23  ;;  %367 = vmatpush.msrb.mxu3 %v334_v24  ;;  %v1273_v23 = vld [vmem:[#allocation12 + $0x40] sm:$0xff] }
  0x54   :  { %431 = vmatpush.msrb.mxu2 %v334_v24  ;;  %388 = vmatpush.msra.mxu0 %v1269_v19  ;;  %v526_v24 = vld [vmem:[#allocation15 + $0x20] sm:$0xff] }
  0x55   :  { %409 = vmatpush.msrb.mxu1 %v1202_v26  ;;  %368 = vmatpush.msrb.mxu3 %v333_v25  ;;  %v315_v26 = vld [vmem:[#allocation12 + $0x38] sm:$0xff] }
  0x56   :  { %432 = vmatpush.msrb.mxu2 %v333_v25  ;;  %389 = vmatpush.msra.mxu0 %v1273_v23 }
  0x57   :  { %410 = vmatpush.msrb.mxu1 %v1207_v30  ;;  %369 = vmatpush.msrb.mxu3 %v332_v27  ;;  %v329_v30 = vld [vmem:[#allocation14 + $0x28] sm:$0xff] }
  0x58   :  { %433 = vmatpush.msrb.mxu2 %v332_v27  ;;  %390 = vmatpush.msra.mxu0 %v315_v26 }
  0x59   :  { %411 = vmatpush.msrb.mxu1 %v1216_v36  ;;  %370 = vmatpush.msrb.mxu3 %v331_v28  ;;  %v327_v36 = vld [vmem:[#allocation14 + $0x18] sm:$0xff] }
  0x5a   :  { %434 = vmatpush.msrb.mxu2 %v331_v28  ;;  %391 = vmatpush.msra.mxu0 %v314_v33 }
  0x5b   :  { %412 = vmatpush.msrb.mxu1 %v1219_v41  ;;  %371 = vmatpush.msrb.mxu3 %v330_v31 }
  0x5c   :  { %435 = vmatpush.msrb.mxu2 %v330_v31  ;;  %392 = vmatpush.msra.mxu0 %v313_v34  ;;  %v523_v31 = vld [vmem:[#allocation15 + $0x8] sm:$0xff] }
  0x5d   :  { %413 = vmatpush.msrb.mxu1 %v1222_v46  ;;  %372 = vmatpush.msrb.mxu3 %v329_v30  ;;  %v308_v46 = vld [vmem:[#allocation12] sm:$0xff] }
  0x5e   :  { %436 = vmatpush.msrb.mxu2 %v329_v30  ;;  %393 = vmatpush.msra.mxu0 %v312_v40  ;;  %v522_v30 = vld [vmem:[#allocation15] sm:$0xff] }
  0x5f   :  { %414 = vmatpush.msrb.mxu1 %v1225_v51  ;;  %373 = vmatpush.msrb.mxu3 %v328_v35 }
  0x60   :  { %437 = vmatpush.msrb.mxu2 %v328_v35  ;;  %394 = vmatpush.msra.mxu0 %v311_v43 }
  0x61   :  { %415 = vmatpush.msrb.mxu1 %v1228_v55  ;;  %374 = vmatpush.msrb.mxu3 %v327_v36 }
  0x62   :  { %438 = vmatpush.msrb.mxu2 %v327_v36  ;;  %395 = vmatpush.msra.mxu0 %v310_v44 }
  0x63   :  { %416 = vmatpush.msrb.mxu1 %v1231_v58  ;;  %375 = vmatpush.msrb.mxu3 %v326_v37 }
  0x64   :  { %439 = vmatpush.msrb.mxu2 %v326_v37  ;;  %396 = vmatpush.msra.mxu0 %v309_v45 }
  0x65   :  { %417 = vmatpush.msrb.mxu1 %v1234_v60  ;;  %376 = vmatpush.msrb.mxu3 %v325_v39  ;;  %v537_v60 = vld [vmem:[#allocation15 + $0x78] sm:$0xff] }
  0x66   :  { %440 = vmatpush.msrb.mxu2 %v325_v39  ;;  %397 = vmatpush.msra.mxu0 %v308_v46 }
  0x67   :  { %418 = vmatpush.msrb.mxu1 %v1238_v63  ;;  %377 = vmatpush.msrb.mxu3 %v324_v42 }
  0x68   :  { %378 = vmatmul.f32.vlgmr.msrb.gmra.mxu3 %v1050_v8  ;;  %441 = vmatpush.msrb.mxu2 %v324_v42 }
  0x69   :  { %419 = vmatpush.msrb.mxu1 %v1241_v3  ;;  %446 = vmatpush.msra.mxu3 %v1247_v16 }
  0x6a   :  { %542 = vmatpush.msrb.mxu0 %v537_v60  ;;  %v574_v60 = vld [vmem:[#allocation17 + $0x38] sm:$0xff] }
  0x6b   :  { %447 = vmatpush.msra.mxu3 %v1250_v18 }
  0x6c   :  { %543 = vmatpush.msrb.mxu0 %v536_v61 }
  0x6d   :  { %448 = vmatpush.msra.mxu3 %v1253_v20  ;;  %v528_v20 = vld [vmem:[#allocation15 + $0x30] sm:$0xff] }
  0x6e   :  { %544 = vmatpush.msrb.mxu0 %v535_v62  ;;  %v755_v62 = vld [vmem:[%s1329_s7] ss:$0 sm:$0xff] }
  0x6f   :  { %449 = vmatpush.msra.mxu3 %v1257_v9 }
  0x70   :  { %545 = vmatpush.msrb.mxu0 %v534_v1 }
  0x71   :  { %450 = vmatpush.msra.mxu3 %v1261_v10 }
  0x72   :  { %546 = vmatpush.msrb.mxu0 %v533_v6 }
  0x73   :  { %451 = vmatpush.msra.mxu3 %v1265_v15 }
  0x74   :  { %547 = vmatpush.msrb.mxu0 %v532_v7  ;;  %v571_v7 = vld [vmem:[#allocation17 + $0x20] sm:$0xff] }
  0x75   :  { %452 = vmatpush.msra.mxu3 %v1269_v19  ;;  %v525_v19 = vld [vmem:[#allocation15 + $0x18] sm:$0xff] }
  0x76   :  { %548 = vmatpush.msrb.mxu0 %v531_v11 }
  0x77   :  { %453 = vmatpush.msra.mxu3 %v1273_v23  ;;  %v524_v23 = vld [vmem:[#allocation15 + $0x10] sm:$0xff] }
  0x78   :  { %549 = vmatpush.msrb.mxu0 %v530_v12  ;;  %v570_v12 = vld [vmem:[#allocation17 + $0x18] sm:$0xff] }
  0x79   :  { %454 = vmatpush.msra.mxu3 %v315_v26 }
  0x7a   :  { %550 = vmatpush.msrb.mxu0 %v529_v17  ;;  %v568_v17 = vld [vmem:[#allocation17 + $0x8] sm:$0xff] }
  0x7b   :  { %455 = vmatpush.msra.mxu3 %v314_v33 }
  0x7c   :  { %551 = vmatpush.msrb.mxu0 %v528_v20  ;;  %v757_v20 = vld [vmem:[%s1332_s10] ss:$0 sm:$0xff] }
  0x7d   :  { %456 = vmatpush.msra.mxu3 %v313_v34 }
  0x7e   :  { %552 = vmatpush.msrb.mxu0 %v527_v22 }
  0x7f   :  { %457 = vmatpush.msra.mxu3 %v312_v40 }
  0x80   :  { %553 = vmatpush.msrb.mxu0 %v526_v24 }
  0x81   :  { %458 = vmatpush.msra.mxu3 %v311_v43 }
  0x82   :  { %554 = vmatpush.msrb.mxu0 %v525_v19  ;;  %v662_v19 = vld [vmem:[#allocation8 + $0x70] sm:$0xff] }
  0x83   :  { %459 = vmatpush.msra.mxu3 %v310_v44 }
  0x84   :  { %555 = vmatpush.msrb.mxu0 %v524_v23  ;;  %v660_v23 = vld [vmem:[#allocation8 + $0x60] sm:$0xff] }
  0x85   :  { %460 = vmatpush.msra.mxu3 %v309_v45 }
  0x86   :  { %556 = vmatpush.msrb.mxu0 %v523_v31  ;;  %v657_v31 = vld [vmem:[#allocation8 + $0x48] sm:$0xff] }
  0x87   :  { %461 = vmatpush.msra.mxu3 %v308_v46 }
  0x88   :  { %557 = vmatpush.msrb.mxu0 %v522_v30  ;;  %v655_v30 = vld [vmem:[#allocation8 + $0x38] sm:$0xff] }
  0xc9   :  { %v247_v38 = vpop.f32.mrf.mxu3 }
  0xca   :  { %285 = vmatmul.f32.vlgmr.msra.gmra.mxu1 %v247_v38 }
  0xcc   :  { %v357_v47 = vpop.f32.mrf.mxu2 }
  0xd1   :  { %v250_v41 = vpop.f32.mrf.mxu3 }
  0xd2   :  { %288 = vmatmul.f32.gmra.mxu1 %v250_v41 }
  0xeb   :  { %v379_v52 = vpop.f32.mrf.mxu3 }
 0x147   :  { %v286_v48 = vpop.f32.mrf.mxu1 }
 0x148   :  { %v360_v49 = vadd.f32 %v357_v47, %v286_v48  ;;  %v582_v47 = vld [vmem:[#allocation17 + $0x78] sm:$0xff]  ;;  %v581_v48 = vld [vmem:[#allocation17 + $0x70] sm:$0xff] }
 0x149   :  { %725 = vmatpush.msra.mxu1 %v582_v47 }
 0x14a   :  { %767 = vtanh.f32 %v360_v49  ;;  %v580_v49 = vld [vmem:[#allocation17 + $0x68] sm:$0xff] }
 0x14b   :  { %726 = vmatpush.msra.mxu1 %v581_v48 }
 0x14d   :  { %727 = vmatpush.msra.mxu1 %v580_v49 }
 0x14f   :  { %v289_v51 = vpop.f32.mrf.mxu1 }
 0x150   :  { %v768_v50 = vpop.eup %767 }
 0x151   :  { %398 = vmatmul.f32.vlgmr.msra.gmra.mxu0 %v768_v50  ;;  %420 = vmatmul.f32.vlgmr.msrb.gmra.mxu1 %v768_v50  ;;  %v579_v50 = vld [vmem:[#allocation17 + $0x60] sm:$0xff] }
 0x152   :  { %587 = vmatpush.msra.mxu0 %v582_v47  ;;  %728 = vmatpush.msra.mxu1 %v579_v50 }
 0x154   :  { %588 = vmatpush.msra.mxu0 %v581_v48 }
 0x156   :  { %589 = vmatpush.msra.mxu0 %v580_v49 }
 0x158   :  { %590 = vmatpush.msra.mxu0 %v579_v50 }
 0x1ce   :  { %v399_v53 = vpop.f32.mrf.mxu0  ;;  %v421_v54 = vpop.f32.mrf.mxu1 }
 0x1cf   :  { %v400_v55 = vadd.f32 %v399_v53, %v379_v52  ;;  %v424_v56 = vadd.f32 %v421_v54, %v289_v51  ;;  %v578_v52 = vld [vmem:[#allocation17 + $0x58] sm:$0xff]  ;;  %v577_v54 = vld [vmem:[#allocation17 + $0x50] sm:$0xff] }
 0x1d0   :  { %591 = vmatpush.msra.mxu0 %v578_v52  ;;  %729 = vmatpush.msra.mxu1 %v578_v52 }
 0x1d1   :  { %769 = vtanh.f32 %v400_v55 }
 0x1d2   :  { %771 = vtanh.f32 %v424_v56  ;;  %v576_v56 = vld [vmem:[#allocation17 + $0x48] sm:$0xff]  ;;  %592 = vmatpush.msra.mxu0 %v577_v54  ;;  %730 = vmatpush.msra.mxu1 %v577_v54 }
 0x1d3   :  { %773 = vrcp.f32 %v1051_v59 }
 0x1d4   :  { %593 = vmatpush.msra.mxu0 %v576_v56  ;;  %731 = vmatpush.msra.mxu1 %v576_v56 }
 0x1d7   :  { %v770_v57 = vpop.eup %769 }
 0x1d8   :  { %v772_v58 = vpop.eup %771  ;;  %442 = vmatmul.f32.vlgmr.msrb.gmra.mxu2 %v770_v57 }
 0x1d9   :  { %462 = vmatmul.f32.vlgmr.msra.gmra.mxu3 %v772_v58  ;;  %v774_v3 = vpop.eup %773  ;;  %v575_v58 = vld [vmem:[#allocation17 + $0x40] sm:$0xff] }
 0x1da   :  { %v478_v8 = vmul.f32 16.0, %v774_v3  ;;  %vm482_vm2 = vweird.f32 %v774_v3  ;;  %594 = vmatpush.msra.mxu0 %v575_v58  ;;  %732 = vmatpush.msra.mxu1 %v575_v58 }
 0x1dc   :  { %v479_v14 = vsub.f32 1.0, %v478_v8  ;;  %595 = vmatpush.msra.mxu0 %v574_v60  ;;  %733 = vmatpush.msra.mxu1 %v574_v60 }
 0x1de   :  { %v480_v21 = vmul.f32 %v774_v3, %v479_v14 }
 0x1e0   :  { %v481_v15 = vadd.f32 %v774_v3, %v480_v21 }
 0x1e2   :  { %v483_v28 = vsel %vm482_vm2, %v774_v3, %v481_v15  ;;  %v572_v3 = vld [vmem:[#allocation17 + $0x28] sm:$0xff] }
 0x25b   :  { %v443_v63 = vpop.f32.mrf.mxu2 }
 0x25c   :  { %v463_v0 = vpop.f32.mrf.mxu3 }
 0x25d   :  { %v464_v2 = vadd.f32 %v463_v0, %v443_v63  ;;  %v573_v63 = vld [vmem:[#allocation17 + $0x30] sm:$0xff] }
 0x25e   :  { %596 = vmatpush.msra.mxu0 %v573_v63  ;;  %734 = vmatpush.msra.mxu1 %v573_v63 }
 0x25f   :  { %775 = vtanh.f32 %v464_v2  ;;  %v756_v2 = vld [vmem:[%s1330_s8] ss:$0 sm:$0xff] }
 0x260   :  { %597 = vmatpush.msra.mxu0 %v572_v3  ;;  %735 = vmatpush.msra.mxu1 %v572_v3 }
 0x262   :  { %598 = vmatpush.msra.mxu0 %v571_v7  ;;  %736 = vmatpush.msra.mxu1 %v571_v7 }
 0x264   :  { %599 = vmatpush.msra.mxu0 %v570_v12  ;;  %737 = vmatpush.msra.mxu1 %v570_v12 }
 0x265   :  { %v776_v13 = vpop.eup %775 }
 0x266   :  { %v470_v16 = vadd.f32 %v776_v13, %v770_v57 }
 0x268   :  { %v471_v18 = vrot.slane %v470_v16, 4 }
 0x26a   :  { %v472_v9 = vadd.f32 %v471_v18, %v470_v16  ;;  %v569_v16 = vld [vmem:[#allocation17 + $0x10] sm:$0xff]  ;;  %v567_v18 = vld [vmem:[#allocation17] sm:$0xff] }
 0x26b   :  { %600 = vmatpush.msra.mxu0 %v569_v16  ;;  %738 = vmatpush.msra.mxu1 %v569_v16 }
 0x26c   :  { %v473_v10 = vrot.slane %v472_v9, 2 }
 0x26d   :  { %601 = vmatpush.msra.mxu0 %v568_v17  ;;  %739 = vmatpush.msra.mxu1 %v568_v17 }
 0x26e   :  { %v474_v25 = vadd.f32 %v473_v10, %v472_v9 }
 0x26f   :  { %602 = vmatpush.msra.mxu0 %v567_v18  ;;  %740 = vmatpush.msra.mxu1 %v567_v18 }
 0x270   :  { %v475_v27 = vrot.slane %v474_v25, 1 }
 0x272   :  { %v476_v26 = vadd.f32 %v475_v27, %v474_v25  ;;  %v663_v25 = vld [vmem:[#allocation8 + $0x78] sm:$0xff]  ;;  %v661_v27 = vld [vmem:[#allocation8 + $0x68] sm:$0xff] }
 0x273   :  { %664 = vmatpush.msra.mxu2 %v663_v25 }
 0x274   :  { %v484_v33 = vmul.f32 %v483_v28, %v476_v26  ;;  %v658_v26 = vld [vmem:[#allocation8 + $0x50] sm:$0xff] }
 0x275   :  { %665 = vmatpush.msra.mxu2 %v662_v19 }
 0x276   :  { %v1295_v34 = vsub.f32 %v776_v13, %v484_v33  ;;  %v485_v35 = vsub.f32 %v770_v57, %v484_v33  ;;  %v656_v33 = vld [vmem:[#allocation8 + $0x40] sm:$0xff] }
 0x277   :  { %666 = vmatpush.msra.mxu2 %v661_v27 }
 0x278   :  { %v488_v36 = vmul.f32 %v1295_v34, %v1295_v34  ;;  %v487_v37 = vmul.f32 %v485_v35, %v485_v35 }
 0x279   :  { %667 = vmatpush.msra.mxu2 %v660_v23 }
 0x27a   :  { %v489_v38 = vadd.f32 %v488_v36, %v487_v37  ;;  %v652_v36 = vld [vmem:[#allocation8 + $0x20] sm:$0xff]  ;;  %v651_v37 = vld [vmem:[#allocation8 + $0x18] sm:$0xff] }
 0x27c   :  { %v490_v39 = vrot.slane %v489_v38, 4 }
 0x27e   :  { %v491_v40 = vadd.f32 %v490_v39, %v489_v38  ;;  %v650_v38 = vld [vmem:[#allocation8 + $0x10] sm:$0xff]  ;;  %v649_v39 = vld [vmem:[#allocation8 + $0x8] sm:$0xff] }
 0x280   :  { %v492_v41 = vrot.slane %v491_v40, 2 }
 0x282   :  { %v493_v42 = vadd.f32 %v492_v41, %v491_v40  ;;  %v648_v40 = vld [vmem:[#allocation8] sm:$0xff] }
 0x283   :  { %v758_v41 = vld [vmem:[%s1334_s12] ss:$0 sm:$0xff]  ;;  %s1052_s12 = smov [#allocation18]  }
 0x284   :  { %v494_v43 = vrot.slane %v493_v42, 1  ;;  %s702_s15 = sshll.u32 %s1052_s12, 4  ;;  %s703_s15 = int_to_ptr.vmem [resolvable:$true] %s702_s15 }
 0x286   :  { %v495_v44 = vadd.f32 %v494_v43, %v493_v42 }
 0x288   :  { %v496_v45 = vmul.f32 %v495_v44, %v483_v28  ;;  %v659_v28 = vld [vmem:[#allocation8 + $0x58] sm:$0xff] }
 0x289   :  { %668 = vmatpush.msra.mxu2 %v659_v28 }
 0x28a   :  { %v497_v46 = vadd.f32 1e-05, %v496_v45 }
 0x28b   :  { %669 = vmatpush.msra.mxu2 %v658_v26 }
 0x28c   :  { %777 = vrsqrt.f32 %v497_v46  ;;  %vm504_vm4 = vweird.f32 %v497_v46 }
 0x28d   :  { %670 = vmatpush.msra.mxu2 %v657_v31 }
 0x28f   :  { %671 = vmatpush.msra.mxu2 %v656_v33 }
 0x291   :  { %672 = vmatpush.msra.mxu2 %v655_v30 }
 0x292   :  { %v778_v51 = vpop.eup %777 }
 0x293   :  { %v499_v53 = vmul.f32 %v778_v51, %v497_v46  ;;  %vm505_vm3 = vweird.f32 %v778_v51 }
 0x294   :  { %vm506_vm5 = vmor %vm504_vm4, %vm505_vm3 }
 0x295   :  { %v500_v55 = vmul.f32 %v778_v51, %v499_v53 }
 0x297   :  { %v501_v57 = vmul.f32 0.5, %v500_v55 }
 0x299   :  { %v502_v59 = vsub.f32 1.5, %v501_v57 }
 0x29b   :  { %v503_v61 = vmul.f32 %v778_v51, %v502_v59 }
 0x29d   :  { %v507_v0 = vsel %vm506_vm5, %v778_v51, %v503_v61 }
 0x29e   :  { %v508_v1 = vmul.f32 %v507_v0, %v485_v35  ;;  %v509_v11 = vmul.f32 %v507_v0, %v1295_v34  ;;  %v654_v34 = vld [vmem:[#allocation8 + $0x30] sm:$0xff]  ;;  %v653_v35 = vld [vmem:[#allocation8 + $0x28] sm:$0xff] }
 0x29f   :  { %673 = vmatpush.msra.mxu2 %v654_v34 }
 0x2a0   :  { %v514_v6 = vmul.f32 %v755_v62, %v508_v1  ;;  %v515_v13 = vmul.f32 %v755_v62, %v509_v11 }
 0x2a1   :  { %674 = vmatpush.msra.mxu2 %v653_v35 }
 0x2a2   :  { %v520_v8 = vadd.f32 %v756_v2, %v514_v6  ;;  %v521_v14 = vadd.f32 %v756_v2, %v515_v13 }
 0x2a3   :  { %675 = vmatpush.msra.mxu2 %v652_v36 }
 0x2a4   :  { %558 = vmatmul.f32.vlgmr.msrb.gmra.mxu0 %v520_v8 }
 0x2a5   :  { %676 = vmatpush.msra.mxu2 %v651_v37 }
 0x2a7   :  { %677 = vmatpush.msra.mxu2 %v650_v38 }
 0x2a9   :  { %678 = vmatpush.msra.mxu2 %v649_v39 }
 0x2ab   :  { %679 = vmatpush.msra.mxu2 %v648_v40 }
 0x2ac   :  { %561 = vmatmul.f32.gmra.mxu0 %v521_v14 }
 0x321   :  { %v559_v21 = vpop.f32.mrf.mxu0 }
 0x322   :  { %v560_v9 = vadd.f32 %v757_v20, %v559_v21 }
 0x324   :  { %v565_v22 = vmax.f32 %v560_v9, 0.0 }
 0x326   :  { %603 = vmatmul.f32.vlgmr.msra.gmra.mxu0 %v565_v22 }
 0x329   :  { %v562_v10 = vpop.f32.mrf.mxu0 }
 0x32a   :  { %v563_v24 = vadd.f32 %v757_v20, %v562_v10 }
 0x32c   :  { %v566_v15 = vmax.f32 %v563_v24, 0.0 }
 0x32e   :  { %606 = vmatmul.f32.vlgmr.msra.gmra.mxu1 %v566_v15 }
 0x3a3   :  { %v604_v42 = vpop.f32.mrf.mxu0 }
 0x3a4   :  { %v605_v43 = vadd.f32 %v758_v41, %v604_v42 }
 0x3a6   :  { %v723_v44 = vmul.f32 -1.442695, %v605_v43 }
 0x3a8   :  { %779 = vpow2.f32 %v723_v44 }
 0x3ab   :  { %v607_v45 = vpop.f32.mrf.mxu1 }
 0x3ac   :  { %v608_v46 = vadd.f32 %v758_v41, %v607_v45 }
 0x3ae   :  { %v780_v47 = vpop.eup %779  ;;  %v724_v48 = vmul.f32 -1.442695, %v608_v46 }
 0x3af   :  { %v616_v49 = vadd.f32 1.0, %v780_v47 }
 0x3b0   :  { %781 = vpow2.f32 %v724_v48 }
 0x3b1   :  { %783 = vrcp.f32 %v616_v49  ;;  %v629_v55 = vand.u32 2147483648, %v616_v49  ;;  %v627_v57 = vand.u32 2147483647, %v616_v49  ;;  %vm623_vm7 = vweird.f32 %v616_v49 }
 0x3b3   :  { %v630_v60 = vor.u32 1.1754944e-38, %v629_v55  ;;  %vm628_vm9 = vcmp.eq.f32.partialorder %v627_v57, 8.507059e+37 }
 0x3b6   :  { %v782_v50 = vpop.eup %781 }
 0x3b7   :  { %v784_v51 = vpop.eup %783  ;;  %v617_v52 = vadd.f32 1.0, %v782_v50 }
 0x3b8   :  { %v619_v53 = vmul.f32 %v784_v51, %v616_v49  ;;  %vm624_vm6 = vweird.f32 %v784_v51 }
 0x3b9   :  { %785 = vrcp.f32 %v617_v52  ;;  %vm625_vm8 = vmor %vm623_vm7, %vm624_vm6  ;;  %v644_v1 = vand.u32 2147483648, %v617_v52  ;;  %v642_v3 = vand.u32 2147483647, %v617_v52  ;;  %vm638_vm11 = vweird.f32 %v617_v52 }
 0x3ba   :  { %v620_v54 = vsub.f32 1.0, %v619_v53 }
 0x3bb   :  { %v645_v7 = vor.u32 1.1754944e-38, %v644_v1  ;;  %vm643_vm13 = vcmp.eq.f32.partialorder %v642_v3, 8.507059e+37 }
 0x3bc   :  { %v621_v56 = vmul.f32 %v784_v51, %v620_v54 }
 0x3be   :  { %v622_v58 = vadd.f32 %v784_v51, %v621_v56 }
 0x3bf   :  { %v786_v59 = vpop.eup %785 }
 0x3c0   :  { %v626_v61 = vsel %vm625_vm8, %v784_v51, %v622_v58  ;;  %v634_v62 = vmul.f32 %v786_v59, %v617_v52  ;;  %vm639_vm10 = vweird.f32 %v786_v59 }
 0x3c1   :  { %v631_v63 = vsel %vm628_vm9, %v630_v60, %v626_v61  ;;  %vm640_vm12 = vmor %vm638_vm11, %vm639_vm10 }
 0x3c2   :  { %680 = vmatmul.f32.vlgmr.msra.gmra.mxu2 %v631_v63  ;;  %v635_v0 = vsub.f32 1.0, %v634_v62 }
 0x3c4   :  { %v636_v2 = vmul.f32 %v786_v59, %v635_v0 }
 0x3c6   :  { %v637_v6 = vadd.f32 %v786_v59, %v636_v2 }
 0x3c8   :  { %v641_v8 = vsel %vm640_vm12, %v786_v59, %v637_v6 }
 0x3c9   :  { %v646_v11 = vsel %vm643_vm13, %v645_v7, %v641_v8 }
 0x3ca   :  { %683 = vmatmul.f32.gmra.mxu2 %v646_v11 }
 0x445   :  { %v681_v12 = vpop.f32.mrf.mxu2 }
 0x446   :  { %v687_v13 = vmax.f32 %v681_v12, 0.0 }
 0x448   :  { %v689_v14 = vmul.f32 %v687_v13, %v1177_v4  ;;  %v693_v16 = vmul.f32 %v687_v13, %v1179_v5 }
 0x44a   :  { %691 = vst [vmem:[#allocation18] sm:$0xff] %v689_v14 }
 0x44b   :  { %696 = vst [vmem:[#allocation18 + $0x10] sm:$0xff] %v693_v16 }
 0x44d   :  { %v684_v17 = vpop.f32.mrf.mxu2 }
 0x44e   :  { %v688_v18 = vmax.f32 %v684_v17, 0.0 }
 0x450   :  { %v690_v20 = vmul.f32 %v688_v18, %v1205_v29  ;;  %v694_v21 = vmul.f32 %v688_v18, %v1209_v32 }
 0x452   :  { %692 = vst [vmem:[#allocation18 + $0x8] sm:$0xff] %v690_v20 }
 0x453   :  { %697 = vst [vmem:[#allocation18 + $0x18] sm:$0xff] %v694_v21 }
 0x454   :  { %710 = dma.vmem_to_hbm [thread:$0]  %s703_s15, 512, %s705_s0, [#allocation5], %s1040_s16, %s1040_s16, %s1041_s17  }
 0x455   :  { %1037 = dma.done.wait [#allocation5], 512  }
 0x456   :  { %1038 = vsyncadd [#allocation5], 4294966784 }
 0x457   :  { %715 = vsyncpa [#allocation4], 1 }
 0x458   :  { %716 = vsyncpa [#allocation7], 1 }
 0x459   :  { %717 = vsyncpa [#allocation10], 1 }
 0x45a   :  { %718 = vsyncpa [#allocation13], 1 }
 0x45b   :  { %719 = vsyncpa [#allocation16], 1 }
 0x45c   :  { %720 = vsyncpa [#allocation5], 1 }

</bundles_post_ra>
